<compile_context>
chip_gen: v5e
topology: v5e:2x2
jax: 0.10.0
libtpu: 0.0.40
codegen_flags: <defaults>
</compile_context>

<pallas_src>
import jax
import jax.numpy as jnp
from jax.experimental import pallas as pl
from jax.experimental.pallas import tpu as pltpu

_MAX_INFLIGHT_DMAS = 4          # a few concurrent DMAs keep the DMA engines busy
_MIN_BYTES_TO_CHUNK = 1 << 20   # below ~1 MiB a single DMA is already optimal


def _plan_chunks(shape, itemsize):
    """Static (start, size) chunks along dim 0, or None for one whole-array DMA."""
    if len(shape) == 0:
        return None
    leading = shape[0]
    nbytes = itemsize
    for d in shape:
        nbytes *= d
    if nbytes < _MIN_BYTES_TO_CHUNK or leading < 2:
        return None
    n = min(_MAX_INFLIGHT_DMAS, leading)
    size = -(-leading // n)                     # ceil-div
    if leading >= 8 * n:
        size = -(-size // 8) * 8                # keep 2-D sublane slices tile-aligned
    chunks = []
    start = 0
    while start < leading:
        sz = min(size, leading - start)
        chunks.append((start, sz))
        start += sz
    return tuple(chunks)


def _make_copy_kernel(chunks):
    """Build an HBM->HBM DMA copy kernel for the given static chunk plan."""
    if chunks is None:
        def kernel(x_hbm, o_hbm, sem):
            cp = pltpu.make_async_copy(x_hbm, o_hbm, sem.at[0])
            cp.start()
            cp.wait()
        return kernel

    def kernel(x_hbm, o_hbm, sem):
        copies = []
        for idx, (start, size) in enumerate(chunks):
            cp = pltpu.make_async_copy(
                x_hbm.at[pl.ds(start, size)],
                o_hbm.at[pl.ds(start, size)],
                sem.at[idx],
            )
            cp.start()                          # issue all DMAs up front (overlapped)
            copies.append(cp)
        for cp in copies:                       # then drain
            cp.wait()
    return kernel


def _materialized_copy(x: jax.Array) -> jax.Array:
    """Pallas HBM->HBM DMA copy of x (same shape/dtype/values, fresh buffer)."""
    chunks = _plan_chunks(x.shape, x.dtype.itemsize)
    n_sems = 1 if chunks is None else len(chunks)
    nbytes = x.size * x.dtype.itemsize
    return pl.pallas_call(
        _make_copy_kernel(chunks),
        out_shape=jax.ShapeDtypeStruct(x.shape, x.dtype),
        in_specs=[pl.BlockSpec(memory_space=pl.ANY)],   # leave in HBM, no auto-DMA
        out_specs=pl.BlockSpec(memory_space=pl.ANY),
        scratch_shapes=[pltpu.SemaphoreType.DMA((n_sems,))],
        cost_estimate=pl.CostEstimate(
            flops=0, transcendentals=0, bytes_accessed=2 * nbytes),
    )(x)


def identity(x: jax.Array, *, materialize: bool = False) -> jax.Array:
    """nn.Identity.forward(x) = x.

    Default: return x as-is (no kernel, no HBM traffic) -- the fastest possible
    Identity.  With materialize=True, return a fresh buffer with identical
    contents via a direct HBM->HBM DMA Pallas kernel.
    """
    if not materialize:
        return x
    if x.size == 0:
        return x
    if x.ndim == 0:
        return _materialized_copy(x.reshape(1)).reshape(())
    return _materialized_copy(x)


if __name__ == "__main__":
    key = jax.random.PRNGKey(0)

    # Shape implied by a ResNet feature map: (batch=2, channels=4, 16, 16).
    x = jax.random.normal(key, (2, 4, 16, 16), dtype=jnp.float32)

    # Fast path: true Identity -- no kernel launched at all.
    assert identity(x) is x

    # Materialized-copy path: single whole-array HBM->HBM DMA.
    y = identity(x, materialize=True)
    jax.block_until_ready(y)
    assert y.shape == x.shape and y.dtype == x.dtype
    assert bool(jnp.array_equal(y, x))

    # A second, larger input exercises the chunked (overlapped-DMA) plan.
    x2 = jax.random.normal(jax.random.PRNGKey(1), (512, 512), dtype=jnp.float32)
    y2 = identity(x2, materialize=True)
    jax.block_until_ready(y2)
    assert bool(jnp.array_equal(y2, x2))

    print("KERNEL_OK")
</pallas_src>

<mosaic_0001>
module attributes {stable_mosaic.version = 11 : i64} {
  func.func @kernel(%arg0: memref<2x4x16x16xf32, #tpu.memory_space<any>>, %arg1: memref<2x4x16x16xf32, #tpu.memory_space<any>>, %arg2: memref<1x!tpu.dma_semaphore, #tpu.memory_space<semaphore_mem>>) attributes {dimension_semantics = [], scalar_prefetch = 0 : i64, scratch_operands = 1 : i64, tpu.core_type = #tpu.core_type<tc>} {
    %c0_i32 = arith.constant 0 : i32
    %0 = tpu.memref_slice %arg2[%c0_i32] : memref<1x!tpu.dma_semaphore, #tpu.memory_space<semaphore_mem>> -> memref<1x!tpu.dma_semaphore, #tpu.memory_space<semaphore_mem>>
    %1 = tpu.memref_squeeze %0 : memref<1x!tpu.dma_semaphore, #tpu.memory_space<semaphore_mem>> -> memref<!tpu.dma_semaphore, #tpu.memory_space<semaphore_mem>>
    tpu.enqueue_dma source(%arg0 : memref<2x4x16x16xf32, #tpu.memory_space<any>>) target(%arg1 : memref<2x4x16x16xf32, #tpu.memory_space<any>>) target_semaphore(%1 : memref<!tpu.dma_semaphore, #tpu.memory_space<semaphore_mem>>)
    %c0_i32_0 = arith.constant 0 : i32
    %2 = tpu.memref_slice %arg2[%c0_i32_0] : memref<1x!tpu.dma_semaphore, #tpu.memory_space<semaphore_mem>> -> memref<1x!tpu.dma_semaphore, #tpu.memory_space<semaphore_mem>>
    %3 = tpu.memref_squeeze %2 : memref<1x!tpu.dma_semaphore, #tpu.memory_space<semaphore_mem>> -> memref<!tpu.dma_semaphore, #tpu.memory_space<semaphore_mem>>
    tpu.wait_dma2 semaphore(%3 : memref<!tpu.dma_semaphore, #tpu.memory_space<semaphore_mem>>) src(%arg0 : memref<2x4x16x16xf32, #tpu.memory_space<any>>) dst(%arg1 : memref<2x4x16x16xf32, #tpu.memory_space<any>>)
    return
  }
}

</mosaic_0001>

<bundles_post_ra>
// kernel: tpu_custom_call.1
= control target key start
LH: loop header
LB: loop body
LE: loop exit
PB: predicated region body
PF: predicated region fallthrough
CT: control target
= control target key end

     0   :  { %s34_s12 = smov [#allocation2]   ;;  %s35_s13 = smov [#allocation3]   ;;  %s53_s0 = inlined_call_operand.hbm [shape: f32[2,4,16,16], index: 0, kind: input, shape index: {}]   ;;  %s54_s1 = inlined_call_operand.hbm [shape: f32[2,4,16,16], index: 1, kind: output, shape index: {}]  }
   0x1   :  { %s10_s8 = sshll.u32 %s53_s0, 4  ;;  %s12_s11 = sshll.u32 %s54_s1, 4  ;;  %s11_s8 = int_to_ptr.hbm [resolvable:$true] %s10_s8  ;;  %s13_s11 = int_to_ptr.hbm [resolvable:$true] %s12_s11 }
   0x2   :  { %s36_s14 = smov 0  }
   0x3   :  { %16 = dma.general %s11_s8, 2048, %s13_s11, %s34_s12, %s35_s13, [#allocation4], %s36_s14, 0  }
   0x4   :  { %32 = dma.done.wait [#allocation2], 2048 }
   0x5   :  { %33 = vsyncadd [#allocation2], 4294965248 }
   0x6   :  { %22 = vsyncmov [#allocation2] }
   0x9   :  { %s23_s15 = vpop.sfrf %22 }
   0xa   :  { %p28_p0 = scmp.ne.s32.totalorder %s23_s15, 0 }
   0xc   :  { %27 = shalt.err (%p28_p0)  }

</bundles_post_ra>
